<compile_context>
chip_gen: v7x
topology: tpu7x:2x2x1
jax: 0.10.0
libtpu: 0.0.40
codegen_flags: <defaults>
</compile_context>

<pallas_src>
import functools
import types

import numpy as np
import jax
import jax.numpy as jnp
from jax.experimental import pallas as pl
from jax.experimental.pallas import tpu as pltpu

# ---- static configuration: Down4(in_channels=8, out_channels=8) -----------------
C_IN = 8                # Down4 in_channels
C_OUT = 8               # Down4 out_channels
C_MID = C_IN // 2       # channels of the tensor fed to Down4.forward (4)
C_BR = C_IN // 4        # channels per pyramid-pooling branch (2)
BINS = (2, 3, 5, 7)
P_CELLS = sum(b * b for b in BINS)      # 87 pyramid cells per image
BN_EPS = 1e-5


def _ceil(x, m):
    return ((x + m - 1) // m) * m


# ---- host-side (trace-time) constant builders ------------------------------------
def _adaptive_bounds(in_size, out_size):
    # nn.AdaptiveAvgPool2d bin boundaries
    return [((i * in_size) // out_size,
             ((i + 1) * in_size + out_size - 1) // out_size)
            for i in range(out_size)]


def _bilinear_matrix(out_size, in_size):
    # F.interpolate(mode="bilinear", align_corners=False) as an (out, in) matrix
    U = np.zeros((out_size, in_size), np.float32)
    scale = in_size / out_size
    for o in range(out_size):
        src = max((o + 0.5) * scale - 0.5, 0.0)
        i0 = min(int(np.floor(src)), in_size - 1)
        i1 = min(i0 + 1, in_size - 1)
        frac = src - i0
        U[o, i0] += 1.0 - frac
        U[o, i1] += frac
    return U


def _tap_offsets(w):
    # dilated 3x3 (dilation=3, padding=3) taps: (dh, dw, lane shift inside one image)
    return tuple((3 * (kh - 1), 3 * (kw - 1), 3 * (kh - 1) * w + 3 * (kw - 1))
                 for kh in range(3) for kw in range(3))


@functools.lru_cache(maxsize=None)
def _layout(n, h, w):
    """Static packed-buffer layout + trace-time numpy constants for (n, h, w).

    Lane ordering everywhere: l = img*h*w + y*w + x (post-pool spatial dims).
    """
    hw, nhw, npool = h * w, n * h * w, n * P_CELLS
    taps = _tap_offsets(w)

    # per-tap boundary masks (replace the old shift matrices): valid lanes only
    tap_mask = np.zeros((9, nhw), np.float32)
    for k, (dh, dw, _) in enumerate(taps):
        vy = ((np.arange(h) + dh >= 0) & (np.arange(h) + dh < h)).astype(np.float32)
        vx = ((np.arange(w) + dw >= 0) & (np.arange(w) + dw < w)).astype(np.float32)
        tap_mask[k] = np.tile(np.outer(vy, vx).reshape(hw), n)

    # adaptive-avg-pool (poolT), bilinear-upsample (upT) and per-branch cell mask
    pool_rows, up_cols, cell_branch = [], [], []
    for bi, b in enumerate(BINS):
        bh, bw = _adaptive_bounds(h, b), _adaptive_bounds(w, b)
        uh, uw = _bilinear_matrix(h, b), _bilinear_matrix(w, b)
        for i in range(b):
            for j in range(b):
                (hs, he), (ws, we) = bh[i], bw[j]
                m = np.zeros((h, w), np.float32)
                m[hs:he, ws:we] = 1.0 / float((he - hs) * (we - ws))
                pool_rows.append(m.reshape(hw))
                up_cols.append(np.outer(uh[:, i], uw[:, j]).reshape(hw))
                cell_branch.append(bi)
    pool_mat = np.stack(pool_rows, 0)             # (P, hw)
    up_mat = np.stack(up_cols, 1)                 # (hw, P)
    eye_n = np.eye(n, dtype=np.float32)
    poolT = np.kron(eye_n, pool_mat.T)            # (nhw, npool)
    upT = np.kron(eye_n, up_mat.T)                # (npool, nhw)
    rows = np.arange(len(BINS) * C_BR) // C_BR
    cmask = np.tile((np.asarray(cell_branch)[None, :] == rows[:, None])
                    .astype(np.float32), (1, n))  # (4*C_BR, npool)

    lay = types.SimpleNamespace(n=n, h=h, w=w, hw=hw, nhw=nhw, npool=npool,
                                taps=taps, tap_mask=tap_mask, poolT=poolT,
                                upT=upT, cmask=cmask)
    # cstA (lane = nhw): [tap masks | upT | b1 | b2 | b3]  (16-row aligned bands)
    lay.a_mask = 0
    lay.a_upt = 16
    lay.a_b1 = _ceil(lay.a_upt + npool, 16)
    lay.a_b2 = lay.a_b1 + 16
    lay.a_b3 = lay.a_b2 + 16
    lay.a_rows = lay.a_b3 + 16
    # cstB (lane = npool): [poolT | branch cell mask | bbr]
    lay.b_pool = 0
    lay.b_cmask = _ceil(nhw, 16)
    lay.b_bbr = lay.b_cmask + 16
    lay.b_rows = lay.b_bbr + 16
    # wts (lane = C_IN): [w1 (9*C_IN, C_MID pad) | w3 (9*C_OUT, C_IN) | wbr | w2x | w2br]
    lay.t_w1 = 0
    lay.t_w3 = _ceil(9 * C_IN, 16)
    lay.t_wbr = lay.t_w3 + _ceil(9 * C_OUT, 16)
    lay.t_w2x = lay.t_wbr + 16
    lay.t_w2br = lay.t_w2x + 16
    lay.t_rows = lay.t_w2br + 16
    return lay


# ---- fused Pallas kernel ----------------------------------------------------------
def _dilated_conv_bn_relu(x_b, wstack, bias, cstA_ref, lay, c_out):
    """ReLU(folded-BN(dilated 3x3 conv(x))).  x_b: (Cin, NHW) bf16 -> (c_out, NHW) f32.

    One consolidated (9*c_out, Cin) MXU matmul yields all 9 taps; each tap is
    placed with a cyclic lane roll (XLU) + a 0/1 boundary mask (VPU) instead of
    the old shift-matrix matmuls.
    """
    t = jnp.dot(wstack, x_b, preferred_element_type=jnp.float32)    # (9*c_out, NHW) f32
    acc = t[4 * c_out:5 * c_out]                                    # center tap: no roll/mask
    for k, (_, _, r) in enumerate(lay.taps):
        if k == 4:
            continue
        tk = pltpu.roll(t[k * c_out:(k + 1) * c_out],
                        shift=(-r) % lay.nhw, axis=1)               # XLU lane rotate
        acc = acc + tk * cstA_ref[lay.a_mask + k:lay.a_mask + k + 1, :]
    return jnp.maximum(acc + bias, 0.0)


def down4_fused_kernel(xph_ref, cstA_ref, cstB_ref, wts_ref, o_ref, *, lay):
    cbr4 = 4 * C_BR

    # ---- MaxPool2d(2, 2): max over the four pre-split window phases ------------
    x1 = jnp.maximum(jnp.maximum(xph_ref[0], xph_ref[1]),
                     jnp.maximum(xph_ref[2], xph_ref[3]))            # (C_IN, NHW) bf16
    # (input channel dim is zero-padded from C_MID to C_IN on host; the matching
    #  w1 columns are zero, so the padding contributes nothing.)

    # ---- Conv1 = LConv3(C_MID, C_IN): dilated 3x3 + folded BN + ReLU -----------
    # TODO(synk): DropBlock(7, 0.18) inside LConv3 is a train-time regularizer;
    #             identity at inference, so it is omitted here.
    w1 = wts_ref[lay.t_w1:lay.t_w1 + 9 * C_IN, :]                    # (72, C_IN) bf16
    b1 = cstA_ref[lay.a_b1:lay.a_b1 + C_IN, :]
    x2 = _dilated_conv_bn_relu(x1, w1, b1, cstA_ref, lay, C_IN)      # (C_IN, NHW) f32
    x2b = x2.astype(jnp.bfloat16)

    # ---- MAP pyramid pooling + Conv2 (1x1), all as bf16 MXU matmuls ------------
    # TODO(synk): MAP source not provided; implemented as PSPNet-style pyramid
    #             pooling (adaptive avg-pool -> 1x1 conv+BN+ReLU -> bilinear
    #             upsample, align_corners=False -> concat with input), fused
    #             with Conv2 by linearity (the concat is never materialized).
    poolT = cstB_ref[lay.b_pool:lay.b_pool + lay.nhw, :]             # (NHW, NPOOL)
    pooled = jnp.dot(x2b, poolT, preferred_element_type=jnp.float32)  # (C_IN, NPOOL)
    wbr = wts_ref[lay.t_wbr:lay.t_wbr + cbr4, :]
    bbr = cstB_ref[lay.b_bbr:lay.b_bbr + cbr4, :]
    cmask = cstB_ref[lay.b_cmask:lay.b_cmask + cbr4, :]
    br = jnp.dot(wbr, pooled.astype(jnp.bfloat16),
                 preferred_element_type=jnp.float32)                 # all 4 branch 1x1s
    br = jnp.maximum(br + bbr, 0.0) * cmask                          # (4*C_BR, NPOOL)
    w2br = wts_ref[lay.t_w2br:lay.t_w2br + C_IN, :]
    z = jnp.dot(w2br, br.astype(jnp.bfloat16),
                preferred_element_type=jnp.float32)                  # Conv2, branch half
    upT = cstA_ref[lay.a_upt:lay.a_upt + lay.npool, :]               # (NPOOL, NHW)
    up = jnp.dot(z.astype(jnp.bfloat16), upT,
                 preferred_element_type=jnp.float32)                 # bilinear upsample
    w2x = wts_ref[lay.t_w2x:lay.t_w2x + C_IN, :]
    b2 = cstA_ref[lay.a_b2:lay.a_b2 + C_IN, :]
    x4 = jnp.dot(w2x, x2b, preferred_element_type=jnp.float32) + up + b2

    # ---- Conv3 = LConv3(C_IN, C_OUT) --------------------------------------------
    w3 = wts_ref[lay.t_w3:lay.t_w3 + 9 * C_OUT, :]
    b3 = cstA_ref[lay.a_b3:lay.a_b3 + C_OUT, :]
    x5 = _dilated_conv_bn_relu(x4.astype(jnp.bfloat16), w3, b3, cstA_ref, lay, C_OUT)

    # lane-dense store: last dim is N*H*W (multiple of 128 here)
    o_ref[...] = x5


# ---- parameter packing ------------------------------------------------------------
def pack_down4_params(params, n=2, h=8, w=8):
    """Pack all weights + trace-time constants into three bf16 buffers (3 DMAs)."""
    lay = _layout(n, h, w)

    def npf(a):
        return np.asarray(jax.device_get(a), np.float32)

    cstA = np.zeros((lay.a_rows, lay.nhw), np.float32)
    cstA[lay.a_mask:lay.a_mask + 9] = lay.tap_mask
    cstA[lay.a_upt:lay.a_upt + lay.npool] = lay.upT
    cstA[lay.a_b1:lay.a_b1 + C_IN] = npf(params["b1"]).reshape(C_IN, 1)
    cstA[lay.a_b2:lay.a_b2 + C_IN] = npf(params["b2"]).reshape(C_IN, 1)
    cstA[lay.a_b3:lay.a_b3 + C_OUT] = npf(params["b3"]).reshape(C_OUT, 1)

    cstB = np.zeros((lay.b_rows, lay.npool), np.float32)
    cstB[lay.b_pool:lay.b_pool + lay.nhw] = lay.poolT
    cstB[lay.b_cmask:lay.b_cmask + 4 * C_BR] = lay.cmask
    cstB[lay.b_bbr:lay.b_bbr + 4 * C_BR] = npf(params["bbr"]).reshape(4 * C_BR, 1)

    wts = np.zeros((lay.t_rows, C_IN), np.float32)
    wts[lay.t_w1:lay.t_w1 + 9 * C_IN, :C_MID] = npf(params["w1"]).reshape(9 * C_IN, C_MID)
    wts[lay.t_w3:lay.t_w3 + 9 * C_OUT, :C_IN] = npf(params["w3"]).reshape(9 * C_OUT, C_IN)
    wts[lay.t_wbr:lay.t_wbr + 4 * C_BR, :C_IN] = npf(params["wbr"])
    wts[lay.t_w2x:lay.t_w2x + C_IN, :C_IN] = npf(params["w2x"])
    wts[lay.t_w2br:lay.t_w2br + C_IN, :4 * C_BR] = npf(params["w2br"])

    return {"cstA": jnp.asarray(cstA, dtype=jnp.bfloat16),
            "cstB": jnp.asarray(cstB, dtype=jnp.bfloat16),
            "wts": jnp.asarray(wts, dtype=jnp.bfloat16)}


# ---- wrapper -----------------------------------------------------------------------
def down4_forward(x_nchw, packed):
    n, c_mid, h0, w0 = x_nchw.shape
    assert c_mid == C_MID and h0 % 2 == 0 and w0 % 2 == 0
    h, w = h0 // 2, w0 // 2
    nhw = n * h * w
    assert nhw % 128 == 0, "lane-dense layout needs N*H*W to be a multiple of 128"
    lay = _layout(n, h, w)
    assert packed["cstA"].shape == (lay.a_rows, lay.nhw)
    assert packed["cstB"].shape == (lay.b_rows, lay.npool)
    assert packed["wts"].shape == (lay.t_rows, C_IN)

    # single host relayout: NCHW -> (4 pooling phases, C_IN (zero-padded), N*Ho*Wo)
    # bf16; it feeds the in-kernel 2x2 max-pool and the channel-first lane layout.
    x = x_nchw.astype(jnp.bfloat16)
    xph = jnp.transpose(x.reshape(n, c_mid, h, 2, w, 2), (3, 5, 1, 0, 2, 4))
    xph = xph.reshape(4, c_mid, nhw)
    xph = jnp.pad(xph, ((0, 0), (0, C_IN - c_mid), (0, 0)))

    out = pl.pallas_call(
        functools.partial(down4_fused_kernel, lay=lay),
        out_shape=jax.ShapeDtypeStruct((C_OUT, nhw), jnp.float32),
    )(xph, packed["cstA"], packed["cstB"], packed["wts"])

    # (C_OUT, N*H*W) -> NCHW
    return jnp.transpose(out.reshape(C_OUT, n, h, w), (1, 0, 2, 3))


# ---- deterministic synthetic parameters --------------------------------------------
def _fold_bn(gamma, beta, mean, var):
    s = gamma / jnp.sqrt(var + BN_EPS)
    return s, beta - mean * s


def init_params(key):
    ks = jax.random.split(key, 40)
    ki = iter(ks)

    def nrm(shape, scale):
        return scale * jax.random.normal(next(ki), shape, dtype=jnp.float32)

    def bn(c):
        gamma = 1.0 + 0.1 * jax.random.normal(next(ki), (c,), dtype=jnp.float32)
        beta = 0.05 * jax.random.normal(next(ki), (c,), dtype=jnp.float32)
        mean = 0.05 * jax.random.normal(next(ki), (c,), dtype=jnp.float32)
        var = 0.5 + jax.random.uniform(next(ki), (c,), dtype=jnp.float32)
        return _fold_bn(gamma, beta, mean, var)

    def lconv3(cin, cout):
        # dilated 3x3 conv (OIHW, bias=False) with BN folded in; taps ordered kh*3+kw
        wt = nrm((cout, cin, 3, 3), 0.2)
        s, t = bn(cout)
        wk = jnp.transpose(wt * s[:, None, None, None], (2, 3, 0, 1))  # (3,3,O,I)
        return wk.reshape(9, cout, cin), t

    p = {}
    p["w1"], p["b1"] = lconv3(C_MID, C_IN)          # Conv1 = LConv3(C_MID, C_IN)

    # MAP branches: 4 x [1x1 conv (bias=False) + BN + ReLU], stacked row-wise
    wbr, bbr = [], []
    for _ in BINS:
        wk = nrm((C_BR, C_IN, 1, 1), 0.3)[:, :, 0, 0]
        sk, tk = bn(C_BR)
        wbr.append(wk * sk[:, None])
        bbr.append(tk)
    p["wbr"] = jnp.concatenate(wbr, axis=0)                          # (4*C_BR, C_IN)
    p["bbr"] = jnp.concatenate(bbr, axis=0)                          # (4*C_BR,)

    # Conv2: 1x1 (2*C_IN -> C_IN) with bias, split along the concat groups
    w2 = nrm((C_IN, 2 * C_IN, 1, 1), 0.2)[:, :, 0, 0]                # (C_IN, 2*C_IN)
    p["w2x"] = w2[:, :C_IN]                                          # x part
    p["w2br"] = w2[:, C_IN:]                                         # branch part
    p["b2"] = nrm((C_IN,), 0.05)

    p["w3"], p["b3"] = lconv3(C_IN, C_OUT)          # Conv3 = LConv3(C_IN, C_OUT)
    return p


if __name__ == "__main__":
    key = jax.random.PRNGKey(0)
    pkey, xkey = jax.random.split(key)
    params = init_params(pkey)
    packed = pack_down4_params(params, n=2, h=8, w=8)
    # input channels = mid_channels = in_channels // 2 = 4 (as in Down4.forward)
    x = jax.random.normal(xkey, (2, C_MID, 16, 16), dtype=jnp.float32)   # NCHW
    out = jax.jit(down4_forward)(x, packed)
    out = jax.block_until_ready(out)
    assert out.shape == (2, C_OUT, 8, 8), out.shape
    assert bool(jnp.all(jnp.isfinite(out)))
    print("KERNEL_OK")
</pallas_src>

<mosaic_0001>
module attributes {stable_mosaic.version = 11 : i64} {
  func.func @down4_fused_kernel(%arg0: memref<4x8x128xbf16, #tpu.memory_space<vmem>>, %arg1: memref<240x128xbf16, #tpu.memory_space<vmem>>, %arg2: memref<160x174xbf16, #tpu.memory_space<vmem>>, %arg3: memref<208x8xbf16, #tpu.memory_space<vmem>>, %arg4: memref<8x128xf32, #tpu.memory_space<vmem>>) attributes {dimension_semantics = [], scalar_prefetch = 0 : i64, scratch_operands = 0 : i64, tpu.core_type = #tpu.core_type<tc>} {
    %c0 = arith.constant 0 : index
    %c0_0 = arith.constant 0 : index
    %c0_1 = arith.constant 0 : index
    %0 = vector.load %arg0[%c0, %c0_0, %c0_1] : memref<4x8x128xbf16, #tpu.memory_space<vmem>>, vector<1x8x128xbf16>
    %1 = vector.shape_cast %0 : vector<1x8x128xbf16> to vector<8x128xbf16>
    %c1 = arith.constant 1 : index
    %c0_2 = arith.constant 0 : index
    %c0_3 = arith.constant 0 : index
    %2 = vector.load %arg0[%c1, %c0_2, %c0_3] : memref<4x8x128xbf16, #tpu.memory_space<vmem>>, vector<1x8x128xbf16>
    %3 = vector.shape_cast %2 : vector<1x8x128xbf16> to vector<8x128xbf16>
    %4 = arith.maximumf %1, %3 : vector<8x128xbf16>
    %c2 = arith.constant 2 : index
    %c0_4 = arith.constant 0 : index
    %c0_5 = arith.constant 0 : index
    %5 = vector.load %arg0[%c2, %c0_4, %c0_5] : memref<4x8x128xbf16, #tpu.memory_space<vmem>>, vector<1x8x128xbf16>
    %6 = vector.shape_cast %5 : vector<1x8x128xbf16> to vector<8x128xbf16>
    %c3 = arith.constant 3 : index
    %c0_6 = arith.constant 0 : index
    %c0_7 = arith.constant 0 : index
    %7 = vector.load %arg0[%c3, %c0_6, %c0_7] : memref<4x8x128xbf16, #tpu.memory_space<vmem>>, vector<1x8x128xbf16>
    %8 = vector.shape_cast %7 : vector<1x8x128xbf16> to vector<8x128xbf16>
    %9 = arith.maximumf %6, %8 : vector<8x128xbf16>
    %10 = arith.maximumf %4, %9 : vector<8x128xbf16>
    %c0_8 = arith.constant 0 : index
    %c0_9 = arith.constant 0 : index
    %11 = vector.load %arg3[%c0_8, %c0_9] : memref<208x8xbf16, #tpu.memory_space<vmem>>, vector<72x8xbf16>
    %c192 = arith.constant 192 : index
    %c0_10 = arith.constant 0 : index
    %12 = vector.load %arg1[%c192, %c0_10] : memref<240x128xbf16, #tpu.memory_space<vmem>>, vector<8x128xbf16>
    %cst = arith.constant dense<0.000000e+00> : vector<72x128xf32>
    %13 = tpu.matmul %11, %10, %cst {dimension_numbers = #tpu.dot_dimension_numbers<[1], [0], [0], [1], [0, 0, 1, 1], [], []>} : vector<72x8xbf16>, vector<8x128xbf16>, vector<72x128xf32> -> vector<72x128xf32>
    %14 = vector.extract_strided_slice %13 {offsets = [32, 0], sizes = [8, 128], strides = [1, 1]} : vector<72x128xf32> to vector<8x128xf32>
    %15 = vector.extract_strided_slice %13 {offsets = [0, 0], sizes = [8, 128], strides = [1, 1]} : vector<72x128xf32> to vector<8x128xf32>
    %c27_i32 = arith.constant 27 : i32
    %16 = tpu.dynamic_rotate %15 by %c27_i32 dim 1 : vector<8x128xf32>, i32 -> vector<8x128xf32>
    %c0_11 = arith.constant 0 : index
    %c0_12 = arith.constant 0 : index
    %17 = vector.load %arg1[%c0_11, %c0_12] : memref<240x128xbf16, #tpu.memory_space<vmem>>, vector<1x128xbf16>
    %18 = arith.extf %17 : vector<1x128xbf16> to vector<1x128xf32>
    %19 = vector.broadcast %18 : vector<1x128xf32> to vector<8x128xf32>
    %20 = arith.mulf %16, %19 : vector<8x128xf32>
    %21 = arith.addf %14, %20 : vector<8x128xf32>
    %22 = vector.extract_strided_slice %13 {offsets = [8, 0], sizes = [8, 128], strides = [1, 1]} : vector<72x128xf32> to vector<8x128xf32>
    %c24_i32 = arith.constant 24 : i32
    %23 = tpu.dynamic_rotate %22 by %c24_i32 dim 1 : vector<8x128xf32>, i32 -> vector<8x128xf32>
    %c1_13 = arith.constant 1 : index
    %c0_14 = arith.constant 0 : index
    %24 = vector.load %arg1[%c1_13, %c0_14] : memref<240x128xbf16, #tpu.memory_space<vmem>>, vector<1x128xbf16>
    %25 = arith.extf %24 : vector<1x128xbf16> to vector<1x128xf32>
    %26 = vector.broadcast %25 : vector<1x128xf32> to vector<8x128xf32>
    %27 = arith.mulf %23, %26 : vector<8x128xf32>
    %28 = arith.addf %21, %27 : vector<8x128xf32>
    %29 = vector.extract_strided_slice %13 {offsets = [16, 0], sizes = [8, 128], strides = [1, 1]} : vector<72x128xf32> to vector<8x128xf32>
    %c21_i32 = arith.constant 21 : i32
    %30 = tpu.dynamic_rotate %29 by %c21_i32 dim 1 : vector<8x128xf32>, i32 -> vector<8x128xf32>
    %c2_15 = arith.constant 2 : index
    %c0_16 = arith.constant 0 : index
    %31 = vector.load %arg1[%c2_15, %c0_16] : memref<240x128xbf16, #tpu.memory_space<vmem>>, vector<1x128xbf16>
    %32 = arith.extf %31 : vector<1x128xbf16> to vector<1x128xf32>
    %33 = vector.broadcast %32 : vector<1x128xf32> to vector<8x128xf32>
    %34 = arith.mulf %30, %33 : vector<8x128xf32>
    %35 = arith.addf %28, %34 : vector<8x128xf32>
    %36 = vector.extract_strided_slice %13 {offsets = [24, 0], sizes = [8, 128], strides = [1, 1]} : vector<72x128xf32> to vector<8x128xf32>
    %c3_i32 = arith.constant 3 : i32
    %37 = tpu.dynamic_rotate %36 by %c3_i32 dim 1 : vector<8x128xf32>, i32 -> vector<8x128xf32>
    %c3_17 = arith.constant 3 : index
    %c0_18 = arith.constant 0 : index
    %38 = vector.load %arg1[%c3_17, %c0_18] : memref<240x128xbf16, #tpu.memory_space<vmem>>, vector<1x128xbf16>
    %39 = arith.extf %38 : vector<1x128xbf16> to vector<1x128xf32>
    %40 = vector.broadcast %39 : vector<1x128xf32> to vector<8x128xf32>
    %41 = arith.mulf %37, %40 : vector<8x128xf32>
    %42 = arith.addf %35, %41 : vector<8x128xf32>
    %43 = vector.extract_strided_slice %13 {offsets = [40, 0], sizes = [8, 128], strides = [1, 1]} : vector<72x128xf32> to vector<8x128xf32>
    %c125_i32 = arith.constant 125 : i32
    %44 = tpu.dynamic_rotate %43 by %c125_i32 dim 1 : vector<8x128xf32>, i32 -> vector<8x128xf32>
    %c5 = arith.constant 5 : index
    %c0_19 = arith.constant 0 : index
    %45 = vector.load %arg1[%c5, %c0_19] : memref<240x128xbf16, #tpu.memory_space<vmem>>, vector<1x128xbf16>
    %46 = arith.extf %45 : vector<1x128xbf16> to vector<1x128xf32>
    %47 = vector.broadcast %46 : vector<1x128xf32> to vector<8x128xf32>
    %48 = arith.mulf %44, %47 : vector<8x128xf32>
    %49 = arith.addf %42, %48 : vector<8x128xf32>
    %50 = vector.extract_strided_slice %13 {offsets = [48, 0], sizes = [8, 128], strides = [1, 1]} : vector<72x128xf32> to vector<8x128xf32>
    %c107_i32 = arith.constant 107 : i32
    %51 = tpu.dynamic_rotate %50 by %c107_i32 dim 1 : vector<8x128xf32>, i32 -> vector<8x128xf32>
    %c6 = arith.constant 6 : index
    %c0_20 = arith.constant 0 : index
    %52 = vector.load %arg1[%c6, %c0_20] : memref<240x128xbf16, #tpu.memory_space<vmem>>, vector<1x128xbf16>
    %53 = arith.extf %52 : vector<1x128xbf16> to vector<1x128xf32>
    %54 = vector.broadcast %53 : vector<1x128xf32> to vector<8x128xf32>
    %55 = arith.mulf %51, %54 : vector<8x128xf32>
    %56 = arith.addf %49, %55 : vector<8x128xf32>
    %57 = vector.extract_strided_slice %13 {offsets = [56, 0], sizes = [8, 128], strides = [1, 1]} : vector<72x128xf32> to vector<8x128xf32>
    %c104_i32 = arith.constant 104 : i32
    %58 = tpu.dynamic_rotate %57 by %c104_i32 dim 1 : vector<8x128xf32>, i32 -> vector<8x128xf32>
    %c7 = arith.constant 7 : index
    %c0_21 = arith.constant 0 : index
    %59 = vector.load %arg1[%c7, %c0_21] : memref<240x128xbf16, #tpu.memory_space<vmem>>, vector<1x128xbf16>
    %60 = arith.extf %59 : vector<1x128xbf16> to vector<1x128xf32>
    %61 = vector.broadcast %60 : vector<1x128xf32> to vector<8x128xf32>
    %62 = arith.mulf %58, %61 : vector<8x128xf32>
    %63 = arith.addf %56, %62 : vector<8x128xf32>
    %64 = vector.extract_strided_slice %13 {offsets = [64, 0], sizes = [8, 128], strides = [1, 1]} : vector<72x128xf32> to vector<8x128xf32>
    %c101_i32 = arith.constant 101 : i32
    %65 = tpu.dynamic_rotate %64 by %c101_i32 dim 1 : vector<8x128xf32>, i32 -> vector<8x128xf32>
    %c8 = arith.constant 8 : index
    %c0_22 = arith.constant 0 : index
    %66 = vector.load %arg1[%c8, %c0_22] : memref<240x128xbf16, #tpu.memory_space<vmem>>, vector<1x128xbf16>
    %67 = arith.extf %66 : vector<1x128xbf16> to vector<1x128xf32>
    %68 = vector.broadcast %67 : vector<1x128xf32> to vector<8x128xf32>
    %69 = arith.mulf %65, %68 : vector<8x128xf32>
    %70 = arith.addf %63, %69 : vector<8x128xf32>
    %71 = arith.extf %12 : vector<8x128xbf16> to vector<8x128xf32>
    %72 = arith.addf %70, %71 : vector<8x128xf32>
    %cst_23 = arith.constant 0.000000e+00 : f32
    %73 = vector.broadcast %cst_23 : f32 to vector<8x128xf32>
    %74 = arith.maximumf %72, %73 : vector<8x128xf32>
    %75 = arith.truncf %74 : vector<8x128xf32> to vector<8x128xbf16>
    %c0_24 = arith.constant 0 : index
    %c0_25 = arith.constant 0 : index
    %76 = vector.load %arg2[%c0_24, %c0_25] : memref<160x174xbf16, #tpu.memory_space<vmem>>, vector<128x174xbf16>
    %cst_26 = arith.constant dense<0.000000e+00> : vector<8x174xf32>
    %77 = tpu.matmul %75, %76, %cst_26 {dimension_numbers = #tpu.dot_dimension_numbers<[1], [0], [0], [1], [0, 0, 1, 1], [], []>} : vector<8x128xbf16>, vector<128x174xbf16>, vector<8x174xf32> -> vector<8x174xf32>
    %c160 = arith.constant 160 : index
    %c0_27 = arith.constant 0 : index
    %78 = vector.load %arg3[%c160, %c0_27] : memref<208x8xbf16, #tpu.memory_space<vmem>>, vector<8x8xbf16>
    %c144 = arith.constant 144 : index
    %c0_28 = arith.constant 0 : index
    %79 = vector.load %arg2[%c144, %c0_28] : memref<160x174xbf16, #tpu.memory_space<vmem>>, vector<8x174xbf16>
    %c128 = arith.constant 128 : index
    %c0_29 = arith.constant 0 : index
    %80 = vector.load %arg2[%c128, %c0_29] : memref<160x174xbf16, #tpu.memory_space<vmem>>, vector<8x174xbf16>
    %81 = arith.truncf %77 : vector<8x174xf32> to vector<8x174xbf16>
    %cst_30 = arith.constant dense<0.000000e+00> : vector<8x174xf32>
    %82 = tpu.matmul %78, %81, %cst_30 {dimension_numbers = #tpu.dot_dimension_numbers<[1], [0], [0], [1], [0, 0, 1, 1], [], []>} : vector<8x8xbf16>, vector<8x174xbf16>, vector<8x174xf32> -> vector<8x174xf32>
    %83 = arith.extf %79 : vector<8x174xbf16> to vector<8x174xf32>
    %84 = arith.addf %82, %83 : vector<8x174xf32>
    %cst_31 = arith.constant 0.000000e+00 : f32
    %85 = vector.broadcast %cst_31 : f32 to vector<8x174xf32>
    %86 = arith.maximumf %84, %85 : vector<8x174xf32>
    %87 = arith.extf %80 : vector<8x174xbf16> to vector<8x174xf32>
    %88 = arith.mulf %86, %87 : vector<8x174xf32>
    %c192_32 = arith.constant 192 : index
    %c0_33 = arith.constant 0 : index
    %89 = vector.load %arg3[%c192_32, %c0_33] : memref<208x8xbf16, #tpu.memory_space<vmem>>, vector<8x8xbf16>
    %90 = arith.truncf %88 : vector<8x174xf32> to vector<8x174xbf16>
    %cst_34 = arith.constant dense<0.000000e+00> : vector<8x174xf32>
    %91 = tpu.matmul %89, %90, %cst_34 {dimension_numbers = #tpu.dot_dimension_numbers<[1], [0], [0], [1], [0, 0, 1, 1], [], []>} : vector<8x8xbf16>, vector<8x174xbf16>, vector<8x174xf32> -> vector<8x174xf32>
    %c16 = arith.constant 16 : index
    %c0_35 = arith.constant 0 : index
    %92 = vector.load %arg1[%c16, %c0_35] : memref<240x128xbf16, #tpu.memory_space<vmem>>, vector<174x128xbf16>
    %93 = arith.truncf %91 : vector<8x174xf32> to vector<8x174xbf16>
    %cst_36 = arith.constant dense<0.000000e+00> : vector<8x128xf32>
    %94 = tpu.matmul %93, %92, %cst_36 {dimension_numbers = #tpu.dot_dimension_numbers<[1], [0], [0], [1], [0, 0, 1, 1], [], []>} : vector<8x174xbf16>, vector<174x128xbf16>, vector<8x128xf32> -> vector<8x128xf32>
    %c176 = arith.constant 176 : index
    %c0_37 = arith.constant 0 : index
    %95 = vector.load %arg3[%c176, %c0_37] : memref<208x8xbf16, #tpu.memory_space<vmem>>, vector<8x8xbf16>
    %c208 = arith.constant 208 : index
    %c0_38 = arith.constant 0 : index
    %96 = vector.load %arg1[%c208, %c0_38] : memref<240x128xbf16, #tpu.memory_space<vmem>>, vector<8x128xbf16>
    %cst_39 = arith.constant dense<0.000000e+00> : vector<8x128xf32>
    %97 = tpu.matmul %95, %75, %cst_39 {dimension_numbers = #tpu.dot_dimension_numbers<[1], [0], [0], [1], [0, 0, 1, 1], [], []>} : vector<8x8xbf16>, vector<8x128xbf16>, vector<8x128xf32> -> vector<8x128xf32>
    %98 = arith.addf %97, %94 : vector<8x128xf32>
    %99 = arith.extf %96 : vector<8x128xbf16> to vector<8x128xf32>
    %100 = arith.addf %98, %99 : vector<8x128xf32>
    %c80 = arith.constant 80 : index
    %c0_40 = arith.constant 0 : index
    %101 = vector.load %arg3[%c80, %c0_40] : memref<208x8xbf16, #tpu.memory_space<vmem>>, vector<72x8xbf16>
    %c224 = arith.constant 224 : index
    %c0_41 = arith.constant 0 : index
    %102 = vector.load %arg1[%c224, %c0_41] : memref<240x128xbf16, #tpu.memory_space<vmem>>, vector<8x128xbf16>
    %103 = arith.truncf %100 : vector<8x128xf32> to vector<8x128xbf16>
    %cst_42 = arith.constant dense<0.000000e+00> : vector<72x128xf32>
    %104 = tpu.matmul %101, %103, %cst_42 {dimension_numbers = #tpu.dot_dimension_numbers<[1], [0], [0], [1], [0, 0, 1, 1], [], []>} : vector<72x8xbf16>, vector<8x128xbf16>, vector<72x128xf32> -> vector<72x128xf32>
    %105 = vector.extract_strided_slice %104 {offsets = [32, 0], sizes = [8, 128], strides = [1, 1]} : vector<72x128xf32> to vector<8x128xf32>
    %106 = vector.extract_strided_slice %104 {offsets = [0, 0], sizes = [8, 128], strides = [1, 1]} : vector<72x128xf32> to vector<8x128xf32>
    %c27_i32_43 = arith.constant 27 : i32
    %107 = tpu.dynamic_rotate %106 by %c27_i32_43 dim 1 : vector<8x128xf32>, i32 -> vector<8x128xf32>
    %c0_44 = arith.constant 0 : index
    %c0_45 = arith.constant 0 : index
    %108 = vector.load %arg1[%c0_44, %c0_45] : memref<240x128xbf16, #tpu.memory_space<vmem>>, vector<1x128xbf16>
    %109 = arith.extf %108 : vector<1x128xbf16> to vector<1x128xf32>
    %110 = vector.broadcast %109 : vector<1x128xf32> to vector<8x128xf32>
    %111 = arith.mulf %107, %110 : vector<8x128xf32>
    %112 = arith.addf %105, %111 : vector<8x128xf32>
    %113 = vector.extract_strided_slice %104 {offsets = [8, 0], sizes = [8, 128], strides = [1, 1]} : vector<72x128xf32> to vector<8x128xf32>
    %c24_i32_46 = arith.constant 24 : i32
    %114 = tpu.dynamic_rotate %113 by %c24_i32_46 dim 1 : vector<8x128xf32>, i32 -> vector<8x128xf32>
    %c1_47 = arith.constant 1 : index
    %c0_48 = arith.constant 0 : index
    %115 = vector.load %arg1[%c1_47, %c0_48] : memref<240x128xbf16, #tpu.memory_space<vmem>>, vector<1x128xbf16>
    %116 = arith.extf %115 : vector<1x128xbf16> to vector<1x128xf32>
    %117 = vector.broadcast %116 : vector<1x128xf32> to vector<8x128xf32>
    %118 = arith.mulf %114, %117 : vector<8x128xf32>
    %119 = arith.addf %112, %118 : vector<8x128xf32>
    %120 = vector.extract_strided_slice %104 {offsets = [16, 0], sizes = [8, 128], strides = [1, 1]} : vector<72x128xf32> to vector<8x128xf32>
    %c21_i32_49 = arith.constant 21 : i32
    %121 = tpu.dynamic_rotate %120 by %c21_i32_49 dim 1 : vector<8x128xf32>, i32 -> vector<8x128xf32>
    %c2_50 = arith.constant 2 : index
    %c0_51 = arith.constant 0 : index
    %122 = vector.load %arg1[%c2_50, %c0_51] : memref<240x128xbf16, #tpu.memory_space<vmem>>, vector<1x128xbf16>
    %123 = arith.extf %122 : vector<1x128xbf16> to vector<1x128xf32>
    %124 = vector.broadcast %123 : vector<1x128xf32> to vector<8x128xf32>
    %125 = arith.mulf %121, %124 : vector<8x128xf32>
    %126 = arith.addf %119, %125 : vector<8x128xf32>
    %127 = vector.extract_strided_slice %104 {offsets = [24, 0], sizes = [8, 128], strides = [1, 1]} : vector<72x128xf32> to vector<8x128xf32>
    %c3_i32_52 = arith.constant 3 : i32
    %128 = tpu.dynamic_rotate %127 by %c3_i32_52 dim 1 : vector<8x128xf32>, i32 -> vector<8x128xf32>
    %c3_53 = arith.constant 3 : index
    %c0_54 = arith.constant 0 : index
    %129 = vector.load %arg1[%c3_53, %c0_54] : memref<240x128xbf16, #tpu.memory_space<vmem>>, vector<1x128xbf16>
    %130 = arith.extf %129 : vector<1x128xbf16> to vector<1x128xf32>
    %131 = vector.broadcast %130 : vector<1x128xf32> to vector<8x128xf32>
    %132 = arith.mulf %128, %131 : vector<8x128xf32>
    %133 = arith.addf %126, %132 : vector<8x128xf32>
    %134 = vector.extract_strided_slice %104 {offsets = [40, 0], sizes = [8, 128], strides = [1, 1]} : vector<72x128xf32> to vector<8x128xf32>
    %c125_i32_55 = arith.constant 125 : i32
    %135 = tpu.dynamic_rotate %134 by %c125_i32_55 dim 1 : vector<8x128xf32>, i32 -> vector<8x128xf32>
    %c5_56 = arith.constant 5 : index
    %c0_57 = arith.constant 0 : index
    %136 = vector.load %arg1[%c5_56, %c0_57] : memref<240x128xbf16, #tpu.memory_space<vmem>>, vector<1x128xbf16>
    %137 = arith.extf %136 : vector<1x128xbf16> to vector<1x128xf32>
    %138 = vector.broadcast %137 : vector<1x128xf32> to vector<8x128xf32>
    %139 = arith.mulf %135, %138 : vector<8x128xf32>
    %140 = arith.addf %133, %139 : vector<8x128xf32>
    %141 = vector.extract_strided_slice %104 {offsets = [48, 0], sizes = [8, 128], strides = [1, 1]} : vector<72x128xf32> to vector<8x128xf32>
    %c107_i32_58 = arith.constant 107 : i32
    %142 = tpu.dynamic_rotate %141 by %c107_i32_58 dim 1 : vector<8x128xf32>, i32 -> vector<8x128xf32>
    %c6_59 = arith.constant 6 : index
    %c0_60 = arith.constant 0 : index
    %143 = vector.load %arg1[%c6_59, %c0_60] : memref<240x128xbf16, #tpu.memory_space<vmem>>, vector<1x128xbf16>
    %144 = arith.extf %143 : vector<1x128xbf16> to vector<1x128xf32>
    %145 = vector.broadcast %144 : vector<1x128xf32> to vector<8x128xf32>
    %146 = arith.mulf %142, %145 : vector<8x128xf32>
    %147 = arith.addf %140, %146 : vector<8x128xf32>
    %148 = vector.extract_strided_slice %104 {offsets = [56, 0], sizes = [8, 128], strides = [1, 1]} : vector<72x128xf32> to vector<8x128xf32>
    %c104_i32_61 = arith.constant 104 : i32
    %149 = tpu.dynamic_rotate %148 by %c104_i32_61 dim 1 : vector<8x128xf32>, i32 -> vector<8x128xf32>
    %c7_62 = arith.constant 7 : index
    %c0_63 = arith.constant 0 : index
    %150 = vector.load %arg1[%c7_62, %c0_63] : memref<240x128xbf16, #tpu.memory_space<vmem>>, vector<1x128xbf16>
    %151 = arith.extf %150 : vector<1x128xbf16> to vector<1x128xf32>
    %152 = vector.broadcast %151 : vector<1x128xf32> to vector<8x128xf32>
    %153 = arith.mulf %149, %152 : vector<8x128xf32>
    %154 = arith.addf %147, %153 : vector<8x128xf32>
    %155 = vector.extract_strided_slice %104 {offsets = [64, 0], sizes = [8, 128], strides = [1, 1]} : vector<72x128xf32> to vector<8x128xf32>
    %c101_i32_64 = arith.constant 101 : i32
    %156 = tpu.dynamic_rotate %155 by %c101_i32_64 dim 1 : vector<8x128xf32>, i32 -> vector<8x128xf32>
    %c8_65 = arith.constant 8 : index
    %c0_66 = arith.constant 0 : index
    %157 = vector.load %arg1[%c8_65, %c0_66] : memref<240x128xbf16, #tpu.memory_space<vmem>>, vector<1x128xbf16>
    %158 = arith.extf %157 : vector<1x128xbf16> to vector<1x128xf32>
    %159 = vector.broadcast %158 : vector<1x128xf32> to vector<8x128xf32>
    %160 = arith.mulf %156, %159 : vector<8x128xf32>
    %161 = arith.addf %154, %160 : vector<8x128xf32>
    %162 = arith.extf %102 : vector<8x128xbf16> to vector<8x128xf32>
    %163 = arith.addf %161, %162 : vector<8x128xf32>
    %cst_67 = arith.constant 0.000000e+00 : f32
    %164 = vector.broadcast %cst_67 : f32 to vector<8x128xf32>
    %165 = arith.maximumf %163, %164 : vector<8x128xf32>
    %c0_68 = arith.constant 0 : index
    %c0_69 = arith.constant 0 : index
    %166 = vector.load %arg4[%c0_68, %c0_69] : memref<8x128xf32, #tpu.memory_space<vmem>>, vector<8x128xf32>
    tpu.vector_store %arg4[%c0_68, %c0_69], %165 {strides = array<i32>} : memref<8x128xf32, #tpu.memory_space<vmem>>, vector<8x128xf32>,
    return
  }
}

</mosaic_0001>

<bundles_post_ra>
// kernel: down4_forward.1
= control target key start
LH: loop header
LB: loop body
LE: loop exit
PB: predicated region body
PF: predicated region fallthrough
CT: control target
= control target key end

     0   :  { %v1013_v0 = vmov 0.0   ;;  %vm1014_vm0 = vmmov 0   ;;  %vm77_vm1 = vcmask 1043456   ;;  %vm61_vm2 = vcmask 64512   ;;  %s1015_s22 = smov 21   ;;  %s1016_s23 = smov 27   ;;  %s1327_s0 = inlined_call_operand.vmem [shape: bf16[4,8,128], index: 0, kind: input, shape index: {}]   ;;  %s1328_s3 = inlined_call_operand.vmem [shape: bf16[208,8], index: 3, kind: input, shape index: {}]   ;;  %s1329_s1 = inlined_call_operand.vmem [shape: bf16[240,128], index: 1, kind: input, shape index: {}]   ;;  %s1330_s2 = inlined_call_operand.vmem [shape: bf16[160,174], index: 2, kind: input, shape index: {}]   ;;  %s1331_s4 = inlined_call_operand.vmem [shape: f32[8,128], index: 4, kind: output, shape index: {}]  }
   0x1   :  { %905 = vmatprep.subr.bf16.mxu0 %v1013_v0  ;;  %955 = vmatprep.subr.bf16.mxu1 %v1013_v0  ;;  %v18_v1 = vld [vmem:[%s1327_s0] sm:$0xf]  ;;  %v835_v2 = vld [vmem:[%s1327_s0 + $0x4] sm:$0xf]  ;;  %v836_v3 = vld [vmem:[%s1327_s0 + $0x8] sm:$0xf]  ;;  %v157_v51 = vlaneseq }
   0x2   :  { %v21_v4 = vmax.bf16 %v835_v2, %v18_v1  ;;  %v837_v5 = vld [vmem:[%s1327_s0 + $0xc] sm:$0xf]  ;;  %907 = vmatprep.mubr.msk.bf16.mxu0 %vm1014_vm0, %v1013_v0  ;;  %911 = vmatprep.mubr.msk.bf16.mxu1 %vm1014_vm0, %v1013_v0  ;;  %v968_v8 = vld [vmem:[%s1328_s3] sm:$0xff]   ;;  %v970_v11 = vld [vmem:[%s1328_s3 + $0x10] sm:$0xff]   ;;  %s1017_s26 = smov 3   ;;  %s1018_s0 = smov 24  }
   0x3   :  { %v26_v6 = vmax.bf16 %v837_v5, %v836_v3  ;;  %v969_v10 = vld [vmem:[%s1328_s3 + $0x8] sm:$0xff]   ;;  %v971_v12 = vld [vmem:[%s1328_s3 + $0x18] sm:$0xff]   ;;  %v972_v13 = vld [vmem:[%s1328_s3 + $0x20] ss:$0 sps:$4 sm:$0xff]   ;;  %s1019_s7 = smov 125   ;;  %s1020_s14 = smov 107  }
   0x4   :  { %v975_v14 = vld [vmem:[%s1330_s2 + $0x4] ss:$8 sps:$4 sm:$0xff]   ;;  %v973_v15 = vld [vmem:[%s1330_s2] ss:$8 sps:$4 sm:$0xff]   ;;  %v978_v16 = vld [vmem:[%s1330_s2 + $0x14] ss:$8 sps:$4 sm:$0xff]  }
   0x5   :  { %v27_v7 = vmax.bf16 %v26_v6, %v21_v4  ;;  %v976_v17 = vld [vmem:[%s1330_s2 + $0x10] ss:$8 sps:$4 sm:$0xff]   ;;  %v981_v18 = vld [vmem:[%s1330_s2 + $0x24] ss:$8 sps:$4 sm:$0xff]   ;;  %v979_v19 = vld [vmem:[%s1330_s2 + $0x20] ss:$8 sps:$4 sm:$0xff]  }
   0x6   :  { %v982_v22 = vld [vmem:[%s1330_s2 + $0x30] ss:$8 sps:$4 sm:$0xff]   ;;  %v984_v23 = vld [vmem:[%s1330_s2 + $0x34] ss:$8 sps:$4 sm:$0xff]   ;;  %v987_v30 = vld [vmem:[%s1330_s2 + $0x44] ss:$8 sps:$4 sm:$0xff]  }
   0x7   :  { %v79_v9 = vsel %vm77_vm1, %v27_v7, 0  ;;  %v985_v31 = vld [vmem:[%s1330_s2 + $0x40] ss:$8 sps:$4 sm:$0xff]   ;;  %v988_v33 = vld [vmem:[%s1330_s2 + $0x50] ss:$8 sps:$4 sm:$0xff]   ;;  %s1021_s17 = smov 104  }
   0x8   :  { %906 = vmatpush3.bf16.msra.mxu0 %v79_v9  ;;  %956 = vmatpush3.bf16.msra.mxu1 %v79_v9  ;;  %v990_v34 = vld [vmem:[%s1330_s2 + $0x54] ss:$8 sps:$4 sm:$0xff]   ;;  %v993_v38 = vld [vmem:[%s1330_s2 + $0x64] ss:$8 sps:$4 sm:$0xff]   ;;  %v991_v39 = vld [vmem:[%s1330_s2 + $0x60] ss:$8 sps:$4 sm:$0xff]  }
   0x9   :  { %327 = vmatprep.subr.bf16.mxu1 %v975_v14  ;;  %v996_v41 = vld [vmem:[%s1330_s2 + $0x74] ss:$8 sps:$4 sm:$0xff]   ;;  %v994_v43 = vld [vmem:[%s1330_s2 + $0x70] ss:$8 sps:$4 sm:$0xff]   ;;  %v1022_v46 = vmov 0   ;;  %s1023_s18 = smov 101  }
   0xa   :  { %v158_v52 = vshrl.u32 %v157_v51, 7  ;;  %v155_v53 = vld [vmem:[%s1329_s1] sm:$0x1]  ;;  %v173_v58 = vld [vmem:[%s1329_s1] sm:$0x2]  ;;  %vm577_vm3 = vcmask 1046528  }
   0xb   :  { %908 = vmatmul.mubr.msk.bf16.vlgmr.msra.gmra.mrb[0].mxu0 %vm61_vm2, %v968_v8  ;;  %912 = vmatmul.mubr.msk.bf16.vlgmr.msra.gmra.mrb[0].mxu1 %vm61_vm2, %v969_v10  ;;  %v156_v54 = vunpack.c.l.bf16 %v155_v53  ;;  %v174_v60 = vunpack.c.l.bf16 %v173_v58  ;;  %v191_v3 = vld [vmem:[%s1329_s1] sm:$0x4]  ;;  %v201_v8 = vld [vmem:[%s1329_s1] sm:$0x8]  ;;  %v997_v53 = vld [vmem:[%s1329_s1 + $0x8] sm:$0xff]   ;;  %vm573_vm4 = vcmask 375808  }
   0xc   :  { %915 = vmatprep.mubr.msk.bf16.mxu1 %vm1014_vm0, %v1013_v0  ;;  %328 = vmatpush1.bf16.msra.mxu1 %v973_v15  ;;  %v159_v55 = vsub.s32 0, %v158_v52  ;;  %v167_v57 = vsub.s32 1, %v158_v52  ;;  %v177_v61 = vsub.s32 2, %v158_v52  ;;  %v185_v6 = vsub.s32 3, %v158_v52  ;;  %v1001_v58 = vld [vmem:[%s1329_s1 + $0x28] sm:$0xff]  }
   0xd   :  { %329 = vmatprep.subr.bf16.mxu1 %v978_v16  ;;  %416 = vmatprep.mubr.bf16.mxu0 %v1022_v46  ;;  %v192_v10 = vunpack.c.l.bf16 %v191_v3  ;;  %v202_v14 = vunpack.c.l.bf16 %v201_v8  ;;  %v205_v15 = vsub.s32 6, %v158_v52 }
   0xe   :  { %v1156_v56 = vrot.slane %v156_v54, %v159_v55  ;;  %v1162_v63 = vrot.slane %v156_v54, %v167_v57  ;;  %v1167_v4 = vrot.slane %v174_v60, %v177_v61  ;;  %v998_v54 = vld [vmem:[%s1329_s1 + $0x10] sm:$0xff]   ;;  %v1000_v57 = vld [vmem:[%s1329_s1 + $0x20] sm:$0xff]  }
   0xf   :  { %v1004_v61 = vld [vmem:[%s1329_s1 + $0x40] sm:$0xff]  }
  0x10   :  { %330 = vmatpush1.bf16.msra.mxu1 %v976_v17 }
  0x11   :  { %331 = vmatprep.subr.bf16.mxu1 %v981_v18 }
  0x13   :  { %916 = vmatmul.mubr.msk.bf16.gmra.mrb[4].mxu1 %vm61_vm2, %v970_v11  ;;  %v195_v11 = vsub.s32 5, %v158_v52 }
  0x14   :  { %919 = vmatprep.mubr.msk.bf16.mxu1 %vm1014_vm0, %v1013_v0  ;;  %332 = vmatpush1.bf16.msra.mxu1 %v979_v19 }
  0x15   :  { %333 = vmatprep.subr.bf16.mxu1 %v984_v23  ;;  %v1176_v18 = vrot.slane %v192_v10, %v195_v11  ;;  %v219_v23 = vld [vmem:[%s1329_s1 + $0x4] sm:$0x1] }
  0x18   :  { %334 = vmatpush1.bf16.msra.mxu1 %v982_v22  ;;  %v213_v22 = vsub.s32 7, %v158_v52  ;;  %v368_v52 = vld [vmem:[%s1328_s3 + $0x50] sm:$0xf] }
  0x19   :  { %335 = vmatprep.subr.bf16.mxu1 %v987_v30 }
  0x1b   :  { %920 = vmatmul.mubr.msk.bf16.gmra.mrb[8].mxu1 %vm61_vm2, %v971_v12 }
  0x1c   :  { %923 = vmatprep.mubr.msk.bf16.mxu1 %vm1014_vm0, %v1013_v0  ;;  %336 = vmatpush1.bf16.msra.mxu1 %v985_v31 }
  0x1d   :  { %337 = vmatprep.subr.bf16.mxu1 %v990_v34 }
  0x20   :  { %338 = vmatpush1.bf16.msra.mxu1 %v988_v33 }
  0x21   :  { %339 = vmatprep.subr.bf16.mxu1 %v993_v38 }
  0x23   :  { %924 = vmatmul.mubr.msk.bf16.gmra.mrb[12].mxu1 %vm61_vm2, %v972_v13  ;;  %v1174_v13 = vrot.slane %v174_v60, %v185_v6  ;;  %v1003_v60 = vld [vmem:[%s1329_s1 + $0x38] sm:$0xff]  }
  0x24   :  { %340 = vmatpush1.bf16.msra.mxu1 %v991_v39  ;;  %359 = vmatprep.mubr.bf16.mxu1 %v1022_v46 }
  0x25   :  { %341 = vmatprep.subr.bf16.mxu1 %v996_v41 }
  0x28   :  { %342 = vmatpush1.bf16.msra.mxu1 %v994_v43 }
  0x29   :  { %581 = vmatprep.subr.bf16.mxu1 %v1022_v46 }
  0xde   :  { %v115_v20 = vpop.f32.mrb[0].mxu0  ;;  %v123_v21 = vpop.f32.mrb[0].mxu1 }
  0xdf   :  { %171 = vrot.lane.b32.xlu1 %v123_v21, %s1015_s22  ;;  %v913_v24 = vpop.f32.mrb[1].mxu1  ;;  %153 = vrot.lane.b32.xlu0 %v115_v20, %s1016_s23  ;;  %v909_v25 = vpop.f32.mrb[1].mxu0  ;;  %v1179_v21 = vrot.slane %v202_v14, %v205_v15 }
  0xe0   :  { %v126_v26 = vpop.f32.mrb[2].mxu1  ;;  %v118_v27 = vpop.f32.mrb[2].mxu0 }
  0xe1   :  { %v914_v28 = vpop.f32.mrb[3].mxu1  ;;  %v910_v29 = vpop.f32.mrb[3].mxu0 }
  0xe2   :  { %v1186_v28 = vrot.slane %v202_v14, %v213_v22  ;;  %v220_v29 = vunpack.c.l.bf16 %v219_v23 }
  0xe3   :  { %181 = vrot.lane.b32.xlu1 %v126_v26, %s1017_s26  ;;  %163 = vrot.lane.b32.xlu0 %v118_v27, %s1018_s0 }
  0xe4   :  { %v1189_v34 = vrot.slane %v220_v29, %v159_v55  ;;  %v999_v55 = vld [vmem:[%s1329_s1 + $0x18] sm:$0xff]  }
  0xe5   :  { %v621_v29 = vld [vmem:[%s1328_s3 + $0x58] sm:$0xf] }
  0xe6   :  { %v131_v32 = vpop.f32.mrb[4].mxu1 }
  0xe7   :  { %v917_v35 = vpop.f32.mrb[5].mxu1 }
  0xe8   :  { %v134_v36 = vpop.f32.mrb[6].mxu1  ;;  %v1194_v35 = vld [vmem:[%s1329_s1 + $0x60] ss:$8 sps:$4 sm:$0xff]  }
  0xe9   :  { %v918_v37 = vpop.f32.mrb[7].mxu1  ;;  %189 = vrot.lane.b32.xlu0 %v134_v36, %s1019_s7  ;;  %v227_v38 = vunpack.c.l.bf16 %v1194_v35 }
  0xee   :  { %v139_v40 = vpop.f32.mrb[8].mxu1 }
  0xef   :  { %199 = vrot.lane.b32.xlu1 %v139_v40, %s1020_s14  ;;  %v921_v42 = vpop.f32.mrb[9].mxu1 }
  0xf0   :  { %v142_v44 = vpop.f32.mrb[10].mxu1 }
  0xf1   :  { %v922_v45 = vpop.f32.mrb[11].mxu1  ;;  %209 = vrot.lane.b32.xlu0 %v142_v44, %s1021_s17 }
  0xf6   :  { %v147_v47 = vpop.f32.mrb[12].mxu1 }
  0xf7   :  { %217 = vrot.lane.b32.xlu1 %v147_v47, %s1023_s18  ;;  %v925_v48 = vpop.f32.mrb[13].mxu1 }
  0xf8   :  { %v150_v49 = vpop.f32.mrb[14].mxu1 }
  0xf9   :  { %v926_v50 = vpop.f32.mrb[15].mxu1 }
 0x151   :  { %v154_v59 = vpop.permute.xlu0 %153  ;;  %v172_v1 = vpop.permute.xlu1 %171 }
 0x152   :  { %v161_v62 = vmul.f32 %v1156_v56, %v154_v59  ;;  %v179_v12 = vmul.f32 %v1167_v4, %v172_v1  ;;  %v1002_v59 = vld [vmem:[%s1329_s1 + $0x30] sm:$0xff]  }
 0x153   :  { %v1006_v1 = vld [vmem:[%s1329_s1 + $0x50] sm:$0xff]  }
 0x154   :  { %v162_v5 = vadd.f32 %v161_v62, %v131_v32  ;;  %v1005_v62 = vld [vmem:[%s1329_s1 + $0x48] sm:$0xff]  }
 0x155   :  { %v164_v2 = vpop.permute.xlu0 %163  ;;  %v182_v16 = vpop.permute.xlu1 %181 }
 0x156   :  { %v169_v7 = vmul.f32 %v1162_v63, %v164_v2  ;;  %v187_v20 = vmul.f32 %v1174_v13, %v182_v16  ;;  %v369_v2 = vld [vmem:[%s1330_s2 + $0x90] sm:$0xff] }
 0x157   :  { %v373_v3 = vunpack.c.l.bf16 %v369_v2  ;;  %v374_v6 = vunpack.c.h.bf16 %v369_v2 }
 0x158   :  { %v170_v9 = vadd.f32 %v169_v7, %v162_v5  ;;  %v370_v5 = vld [vmem:[%s1330_s2 + $0x80] sm:$0xff] }
 0x15a   :  { %v180_v17 = vadd.f32 %v179_v12, %v170_v9  ;;  %v427_v9 = vunpack.c.l.bf16 %v370_v5  ;;  %v428_v12 = vunpack.c.h.bf16 %v370_v5 }
 0x15b   :  { %v190_v19 = vpop.permute.xlu0 %189 }
 0x15c   :  { %v188_v24 = vadd.f32 %v187_v20, %v180_v17  ;;  %v197_v25 = vmul.f32 %v1176_v18, %v190_v19 }
 0x15e   :  { %v198_v31 = vadd.f32 %v197_v25, %v188_v24  ;;  %v431_v24 = vld [vmem:[%s1328_s3 + $0x60] sm:$0xf] }
 0x161   :  { %v200_v26 = vpop.permute.xlu1 %199 }
 0x162   :  { %v207_v27 = vmul.f32 %v1179_v21, %v200_v26  ;;  %v1007_v26 = vld [vmem:[%s1329_s1 + $0x58] sm:$0x7f]  }
 0x163   :  { %v210_v30 = vpop.permute.xlu0 %209 }
 0x164   :  { %v208_v32 = vadd.f32 %v207_v27, %v198_v31  ;;  %v215_v33 = vmul.f32 %v1186_v28, %v210_v30  ;;  %v579_v27 = vsel %vm577_vm3, %v1007_v26, 0 }
 0x166   :  { %v216_v37 = vadd.f32 %v215_v33, %v208_v32 }
 0x169   :  { %v218_v36 = vpop.permute.xlu1 %217 }
 0x16a   :  { %v225_v39 = vmul.f32 %v1189_v34, %v218_v36 }
 0x16c   :  { %v226_v40 = vadd.f32 %v225_v39, %v216_v37 }
 0x16e   :  { %v228_v41 = vadd.f32 %v227_v38, %v226_v40 }
 0x170   :  { %v229_v42 = vmax.f32 %v228_v41, 0.0 }
 0x172   :  { %v1198_v43 = vpack.c.bf16 %v229_v42, %v229_v42  ;;  %v669_v42 = vunpack.c.h.bf16 %v1194_v35  ;;  %v1009_v35 = vld [vmem:[%s1328_s3 + $0x30] sm:$0xff]  }
 0x174   :  { %360 = vmatmul.mubr.bf16.vlgmr.msra.gmra.mrb[16].mxu1 %v1198_v43  ;;  %v627_v25 = vsel %vm77_vm1, %v1198_v43, 0 }
 0x175   :  { %582 = vmatpush1.bf16.msra.mxu1 %v997_v53  ;;  %v1010_v53 = vld [vmem:[%s1328_s3 + $0x38] sm:$0xff]  }
 0x176   :  { %583 = vmatprep.subr.bf16.mxu1 %v1022_v46 }
 0x179   :  { %584 = vmatpush1.bf16.msra.mxu1 %v998_v54  ;;  %v1011_v54 = vld [vmem:[%s1328_s3 + $0x40] sm:$0xff]  }
 0x17a   :  { %585 = vmatprep.subr.bf16.mxu1 %v1022_v46 }
 0x17d   :  { %586 = vmatpush1.bf16.msra.mxu1 %v999_v55  ;;  %v1012_v55 = vld [vmem:[%s1328_s3 + $0x48] ss:$0 sps:$4 sm:$0xff]  }
 0x17e   :  { %587 = vmatprep.subr.bf16.mxu1 %v1022_v46 }
 0x181   :  { %588 = vmatpush1.bf16.msra.mxu1 %v1000_v57 }
 0x182   :  { %589 = vmatprep.subr.bf16.mxu1 %v1022_v46 }
 0x185   :  { %590 = vmatpush1.bf16.msra.mxu1 %v1001_v58 }
 0x186   :  { %591 = vmatprep.subr.bf16.mxu1 %v1022_v46 }
 0x189   :  { %592 = vmatpush1.bf16.msra.mxu1 %v1002_v59 }
 0x18a   :  { %593 = vmatprep.subr.bf16.mxu1 %v1022_v46 }
 0x18d   :  { %594 = vmatpush1.bf16.msra.mxu1 %v1003_v60 }
 0x18e   :  { %595 = vmatprep.subr.bf16.mxu1 %v1022_v46 }
 0x191   :  { %596 = vmatpush1.bf16.msra.mxu1 %v1004_v61 }
 0x192   :  { %597 = vmatprep.subr.bf16.mxu1 %v1022_v46 }
 0x195   :  { %598 = vmatpush1.bf16.msra.mxu1 %v1005_v62 }
 0x196   :  { %599 = vmatprep.subr.bf16.mxu1 %v1022_v46 }
 0x199   :  { %600 = vmatpush1.bf16.msra.mxu1 %v1006_v1 }
 0x19a   :  { %601 = vmatprep.subr.bf16.mxu1 %v1022_v46 }
 0x19d   :  { %602 = vmatpush1.bf16.msra.mxu1 %v579_v27 }
 0x247   :  { %v361_v44 = vpop.f32.mrb[16].mxu1 }
 0x248   :  { %v371_v45 = vpack.c.bf16 %v361_v44, %v361_v44  ;;  %v363_v47 = vpop.f32.mrb[17].mxu1 }
 0x249   :  { %v372_v48 = vpack.c.bf16 %v363_v47, %v363_v47  ;;  %v365_v49 = vpop.f32.mrb[18].mxu1 }
 0x24a   :  { %v379_v50 = vsel %vm77_vm1, %v371_v45, 0  ;;  %v366_v51 = vpop.f32.mrb[19].mxu1 }
 0x24b   :  { %864 = vmatprep.subr.msk.bf16.mxu0 %vm77_vm1, %v372_v48 }
 0x24c   :  { %385 = vmatpush1.bf16.msra.mxu0 %v379_v50 }
 0x24f   :  { %865 = vmatmul.mubr.msk.bf16.vlgmr.msra.gmra.mrb[4].mxu0 %vm61_vm2, %v368_v52  ;;  %v1008_v52 = vld [vmem:[%s1328_s3 + $0x28] sm:$0xff]  }
 0x250   :  { %475 = vmatprep.mubr.bf16.mxu0 %v1022_v46 }
 0x322   :  { %v418_v7 = vpop.f32.mrb[4].mxu0 }
 0x323   :  { %v419_v8 = vadd.f32 %v418_v7, %v373_v3  ;;  %v420_v10 = vpop.f32.mrb[5].mxu0 }
 0x324   :  { %v421_v11 = vadd.f32 %v420_v10, %v374_v6  ;;  %v422_v14 = vpop.f32.mrb[6].mxu0 }
 0x325   :  { %v425_v15 = vmax.f32 %v419_v8, 0.0  ;;  %v423_v16 = vpop.f32.mrb[7].mxu0 }
 0x326   :  { %v426_v46 = vmax.f32 %v421_v11, 0.0 }
 0x327   :  { %v429_v17 = vmul.f32 %v427_v9, %v425_v15 }
 0x328   :  { %v430_v19 = vmul.f32 %v428_v12, %v426_v46 }
 0x329   :  { %v432_v20 = vpack.c.bf16 %v429_v17, %v429_v17 }
 0x32a   :  { %v433_v22 = vpack.c.bf16 %v430_v19, %v430_v19 }
 0x32b   :  { %v438_v23 = vsel %vm77_vm1, %v432_v20, 0 }
 0x32c   :  { %866 = vmatprep.subr.msk.bf16.mxu0 %vm77_vm1, %v433_v22 }
 0x32d   :  { %444 = vmatpush1.bf16.msra.mxu0 %v438_v23 }
 0x32e   :  { %927 = vmatprep.subr.bf16.mxu0 %v1013_v0 }
 0x330   :  { %867 = vmatmul.mubr.msk.bf16.vlgmr.msra.gmra.mrb[8].mxu0 %vm61_vm2, %v431_v24 }
 0x331   :  { %928 = vmatpush3.bf16.msra.mxu0 %v627_v25  ;;  %929 = vmatprep.mubr.msk.bf16.mxu0 %vm1014_vm0, %v1013_v0 }
 0x332   :  { %933 = vmatprep.subr.bf16.mxu0 %v1013_v0 }
 0x338   :  { %930 = vmatmul.mubr.msk.bf16.vlgmr.msra.gmra.mrb[12].mxu0 %vm61_vm2, %v621_v29 }
 0x339   :  { %935 = vmatprep.mubr.msk.bf16.mxu0 %vm1014_vm0, %v1013_v0 }
 0x403   :  { %v477_v30 = vpop.f32.mrb[8].mxu0 }
 0x404   :  { %v479_v31 = vpop.f32.mrb[9].mxu0  ;;  %v506_v36 = vpack.c.bf16 %v477_v30, %v477_v30 }
 0x405   :  { %v507_v32 = vpack.c.bf16 %v479_v31, %v479_v31  ;;  %v481_v33 = vpop.f32.mrb[10].mxu0 }
 0x406   :  { %v482_v37 = vpop.f32.mrb[11].mxu0 }
 0x407   :  { %879 = vmatprep.mubr.msk.bf16.mxu1 %vm573_vm4, %v507_v32 }
 0x408   :  { %614 = vmatmul.mubr.bf16.vlgmr.msra.gmra.mrb[20].mxu1 %v506_v36 }
 0x40b   :  { %v663_v38 = vpop.f32.mrb[12].mxu0 }
 0x40c   :  { %v931_v39 = vpop.f32.mrb[13].mxu0 }
 0x40d   :  { %v666_v40 = vpop.f32.mrb[14].mxu0 }
 0x40e   :  { %v932_v41 = vpop.f32.mrb[15].mxu0 }
 0x4db   :  { %v615_v43 = vpop.f32.mrb[20].mxu1 }
 0x4dc   :  { %v664_v44 = vadd.f32 %v663_v38, %v615_v43  ;;  %v617_v45 = vpop.f32.mrb[21].mxu1 }
 0x4dd   :  { %v618_v47 = vpop.f32.mrb[22].mxu1 }
 0x4de   :  { %v670_v48 = vadd.f32 %v669_v42, %v664_v44  ;;  %v619_v49 = vpop.f32.mrb[23].mxu1 }
 0x4e0   :  { %v681_v50 = vpack.c.bf16 %v670_v48, %v670_v48 }
 0x4e2   :  { %v721_v51 = vsel %vm77_vm1, %v681_v50, 0 }
 0x4e3   :  { %934 = vmatpush3.bf16.msra.mxu0 %v721_v51 }
 0x4e6   :  { %936 = vmatmul.mubr.msk.bf16.vlgmr.msra.gmra.mrb[16].mxu0 %vm61_vm2, %v1008_v52 }
 0x4e7   :  { %939 = vmatprep.mubr.msk.bf16.mxu0 %vm1014_vm0, %v1013_v0 }
 0x4ee   :  { %940 = vmatmul.mubr.msk.bf16.gmra.mrb[20].mxu0 %vm61_vm2, %v1009_v35 }
 0x4ef   :  { %943 = vmatprep.mubr.msk.bf16.mxu0 %vm1014_vm0, %v1013_v0 }
 0x4f6   :  { %944 = vmatmul.mubr.msk.bf16.gmra.mrb[24].mxu0 %vm61_vm2, %v1010_v53 }
 0x4f7   :  { %947 = vmatprep.mubr.msk.bf16.mxu0 %vm1014_vm0, %v1013_v0 }
 0x4fe   :  { %948 = vmatmul.mubr.msk.bf16.gmra.mrb[28].mxu0 %vm61_vm2, %v1011_v54 }
 0x4ff   :  { %951 = vmatprep.mubr.msk.bf16.mxu0 %vm1014_vm0, %v1013_v0 }
 0x506   :  { %952 = vmatmul.mubr.msk.bf16.gmra.mrb[32].mxu0 %vm61_vm2, %v1012_v55 }
 0x5b9   :  { %v757_v57 = vpop.f32.mrb[16].mxu0 }
 0x5ba   :  { %795 = vrot.lane.b32.xlu0 %v757_v57, %s1016_s23  ;;  %v937_v58 = vpop.f32.mrb[17].mxu0 }
 0x5bb   :  { %v760_v59 = vpop.f32.mrb[18].mxu0 }
 0x5bc   :  { %799 = vrot.lane.b32.xlu1 %v760_v59, %s1018_s0  ;;  %v938_v60 = vpop.f32.mrb[19].mxu0 }
 0x5c1   :  { %v765_v61 = vpop.f32.mrb[20].mxu0 }
 0x5c2   :  { %803 = vrot.lane.b32.xlu0 %v765_v61, %s1015_s22  ;;  %v941_v62 = vpop.f32.mrb[21].mxu0 }
 0x5c3   :  { %v768_v1 = vpop.f32.mrb[22].mxu0 }
 0x5c4   :  { %807 = vrot.lane.b32.xlu1 %v768_v1, %s1017_s26  ;;  %v942_v0 = vpop.f32.mrb[23].mxu0 }
 0x5c9   :  { %v773_v2 = vpop.f32.mrb[24].mxu0 }
 0x5ca   :  { %v945_v3 = vpop.f32.mrb[25].mxu0 }
 0x5cb   :  { %v776_v5 = vpop.f32.mrb[26].mxu0 }
 0x5cc   :  { %811 = vrot.lane.b32.xlu0 %v776_v5, %s1019_s7  ;;  %v946_v6 = vpop.f32.mrb[27].mxu0 }
 0x5d1   :  { %v781_v7 = vpop.f32.mrb[28].mxu0 }
 0x5d2   :  { %815 = vrot.lane.b32.xlu1 %v781_v7, %s1020_s14  ;;  %v949_v8 = vpop.f32.mrb[29].mxu0 }
 0x5d3   :  { %v784_v9 = vpop.f32.mrb[30].mxu0 }
 0x5d4   :  { %819 = vrot.lane.b32.xlu0 %v784_v9, %s1021_s17  ;;  %v950_v10 = vpop.f32.mrb[31].mxu0 }
 0x5d9   :  { %v789_v11 = vpop.f32.mrb[32].mxu0 }
 0x5da   :  { %823 = vrot.lane.b32.xlu1 %v789_v11, %s1023_s18  ;;  %v953_v12 = vpop.f32.mrb[33].mxu0 }
 0x5db   :  { %v792_v14 = vpop.f32.mrb[34].mxu0 }
 0x5dc   :  { %v954_v15 = vpop.f32.mrb[35].mxu0 }
 0x62c   :  { %v796_v16 = vpop.permute.xlu0 %795 }
 0x62d   :  { %v797_v46 = vmul.f32 %v796_v16, %v1156_v56 }
 0x62e   :  { %v800_v17 = vpop.permute.xlu1 %799 }
 0x62f   :  { %v798_v20 = vadd.f32 %v797_v46, %v773_v2  ;;  %v801_v22 = vmul.f32 %v800_v17, %v1162_v63  ;;  %v680_v63 = vld [vmem:[%s1329_s1 + $0x70] sm:$0xf] }
 0x630   :  { %v827_v40 = vunpack.c.l.bf16 %v680_v63 }
 0x631   :  { %v802_v25 = vadd.f32 %v801_v22, %v798_v20 }
 0x634   :  { %v804_v19 = vpop.permute.xlu0 %803 }
 0x635   :  { %v805_v23 = vmul.f32 %v804_v19, %v1167_v4 }
 0x636   :  { %v808_v24 = vpop.permute.xlu1 %807 }
 0x637   :  { %v806_v27 = vadd.f32 %v805_v23, %v802_v25  ;;  %v809_v29 = vmul.f32 %v808_v24, %v1174_v13 }
 0x639   :  { %v810_v32 = vadd.f32 %v809_v29, %v806_v27 }
 0x63e   :  { %v812_v26 = vpop.permute.xlu0 %811 }
 0x63f   :  { %v813_v30 = vmul.f32 %v812_v26, %v1176_v18 }
 0x641   :  { %v814_v36 = vadd.f32 %v813_v30, %v810_v32 }
 0x644   :  { %v816_v31 = vpop.permute.xlu1 %815 }
 0x645   :  { %v817_v33 = vmul.f32 %v816_v31, %v1179_v21 }
 0x646   :  { %v820_v56 = vpop.permute.xlu0 %819 }
 0x647   :  { %v818_v37 = vadd.f32 %v817_v33, %v814_v36  ;;  %v821_v38 = vmul.f32 %v820_v56, %v1186_v28 }
 0x649   :  { %v822_v39 = vadd.f32 %v821_v38, %v818_v37 }
 0x64c   :  { %v824_v4 = vpop.permute.xlu1 %823 }
 0x64d   :  { %v825_v13 = vmul.f32 %v824_v4, %v1189_v34 }
 0x64f   :  { %v826_v41 = vadd.f32 %v825_v13, %v822_v39 }
 0x651   :  { %v828_v18 = vadd.f32 %v827_v40, %v826_v41 }
 0x653   :  { %v829_v42 = vmax.f32 %v828_v18, 0.0 }
 0x655   :  { %830 = vst [vmem:[%s1331_s4] sm:$0xff] %v829_v42 }

</bundles_post_ra>
